<compile_context>
chip_gen: v7x
topology: tpu7x:2x2x1
jax: 0.10.0
libtpu: 0.0.40
codegen_flags: <defaults>
</compile_context>

<pallas_src>
import functools

import jax
import jax.numpy as jnp
from jax.experimental import pallas as pl
from jax.experimental.pallas import tpu as pltpu

ALPHA = 0.5
BETA = 0.5          # unused by the reference forward, kept for parity
CE_RATIO = 0.5

LANES = 128
SUBLANES = 8
MAX_TILE_ROWS = 8192            # 8192x128 f32 = 4 MiB per operand per block
CHUNK_ROWS = 32                 # fori_loop chunk: (32,128) f32 = 16 KiB/operand
VMEM_LIMIT_BYTES = 32 * 1024 * 1024
AUTO_PALLAS_MIN_ELEMS = 64 * 1024   # below this, auto-dispatch uses plain jnp
FORCE_PALLAS_MIN_ELEMS = SUBLANES * LANES  # need at least 8 full 128-lane rows


def _nsplit_for_device():
    """Reduction split count: >1 only where 2 TensorCores share one device."""
    try:
        kind = jax.devices()[0].device_kind.lower()
    except Exception:
        return 1
    # v4 / v5p (megacore) and v7x expose two TensorCores behind one Pallas
    # device; v5e / v6e are single-TC, where a split axis is pure overhead.
    if any(tag in kind for tag in ("v4", "v5p", "v7", "7x")):
        return 2
    return 1


def _combo_kernel(x_ref, t_ref, acc_ref, *, steps, tile_rows, chunk_rows,
                  full_rows, rem_lanes, eps, binary_targets):
    p = pl.program_id(0)          # split (TensorCore) index
    i = pl.program_id(1)          # reduction step within the split
    blk = p * steps + i           # logical (unclamped) row-tile index

    @pl.when(i == 0)
    def _init():
        acc_ref[...] = jnp.zeros_like(acc_ref)

    n_chunks = tile_rows // chunk_rows    # static; chunk_rows divides tile_rows

    # Column fold (chunk,128)->(8,128).  For chunk_rows > 8 it is offloaded to
    # the otherwise-idle MXU with a tiled-identity LHS (output row r sums the
    # chunk rows with row % 8 == r), so the VPU slots stay free for the
    # streaming elementwise work.  Total of the folded slab == total of input.
    if chunk_rows == SUBLANES:
        fold = lambda v: v
    else:
        rr = jax.lax.broadcasted_iota(jnp.int32, (SUBLANES, chunk_rows), 0)
        cc = jax.lax.broadcasted_iota(jnp.int32, (SUBLANES, chunk_rows), 1)
        fold_lhs = (cc % SUBLANES == rr).astype(jnp.float32)
        fold = lambda v: jnp.dot(fold_lhs, v,
                                 preferred_element_type=jnp.float32)

    def make_body(masked):
        def body(c, carry):
            s_xt, s_x, s_t, s_ce = carry
            r0 = pl.multiple_of(c * chunk_rows, chunk_rows)
            xv = x_ref[pl.ds(r0, chunk_rows), :]
            tv = t_ref[pl.ds(r0, chunk_rows), :]
            xc = jnp.clip(xv, eps, 1.0 - eps)
            if binary_targets:
                # Opt-in: a single log per element when targets are exact 0/1.
                pos = tv >= 0.5
                ce = (jnp.where(pos, 1.0, 1.0 - ALPHA)
                      * jnp.log(jnp.where(pos, xc, 1.0 - xc)))
            else:
                # ALPHA is factored out and applied once in the epilogue.
                ce = (tv * jnp.log(xc)
                      + (1.0 - ALPHA) * ((1.0 - tv) * jnp.log(1.0 - xc)))
            if masked:
                # Row-space validity mask (no flat int32 element index, so it
                # cannot overflow for huge inputs).  Applied AFTER the logs so
                # NaN/Inf from padded / undefined block rows cannot leak in.
                row = jax.lax.broadcasted_iota(jnp.int32, (chunk_rows, LANES), 0)
                lane = jax.lax.broadcasted_iota(jnp.int32, (chunk_rows, LANES), 1)
                g_row = blk * tile_rows + r0 + row
                valid = ((g_row < full_rows)
                         | ((g_row == full_rows) & (lane < rem_lanes)))
                xv = jnp.where(valid, xv, 0.0)
                tv = jnp.where(valid, tv, 0.0)
                ce = jnp.where(valid, ce, 0.0)
            return (s_xt + fold(xv * tv), s_x + fold(xv),
                    s_t + fold(tv), s_ce + fold(ce))
        return body

    zero = jnp.zeros((SUBLANES, LANES), jnp.float32)
    init = (zero, zero, zero, zero)

    # Only tiles that can reach a row index >= full_rows (zero pad, partial
    # last block, or a clamped re-read tail step of the split) need the mask;
    # interior tiles take the unmasked fast path.
    needs_mask = (blk + 1) * tile_rows > full_rows
    s_xt, s_x, s_t, s_ce = jax.lax.cond(
        needs_mask,
        lambda: jax.lax.fori_loop(0, n_chunks, make_body(True), init, unroll=2),
        lambda: jax.lax.fori_loop(0, n_chunks, make_body(False), init, unroll=2))

    # Single accumulator read-modify-write per grid step.
    acc_ref[...] += jnp.stack([s_xt, s_x, s_t, s_ce])[None]


def _combo_partials_pallas(x2d, t2d, n, nsplit, binary_targets, eps):
    rows = x2d.shape[0]
    tile_rows = min(MAX_TILE_ROWS, (rows // SUBLANES) * SUBLANES)
    chunk_rows = CHUNK_ROWS if tile_rows % CHUNK_ROWS == 0 else SUBLANES
    tiles = pl.cdiv(rows, tile_rows)
    steps = pl.cdiv(tiles, nsplit)
    full_rows, rem_lanes = divmod(n, LANES)

    kernel = functools.partial(
        _combo_kernel, steps=steps, tile_rows=tile_rows, chunk_rows=chunk_rows,
        full_rows=full_rows, rem_lanes=rem_lanes, eps=float(eps),
        binary_targets=binary_targets)

    def in_map(p, i):
        # Clamp so a split whose tail step runs past the last tile just
        # re-reads it; that step contributes exactly zero (fully masked).
        # With nsplit == 1 (v5e/v6e) the clamp is a no-op and there is no
        # wasted tile.
        return (jnp.minimum(p * steps + i, tiles - 1), 0)

    acc = pl.pallas_call(
        kernel,
        out_shape=jax.ShapeDtypeStruct((nsplit, 4, SUBLANES, LANES),
                                       jnp.float32),
        grid_spec=pltpu.PrefetchScalarGridSpec(
            num_scalar_prefetch=0,
            grid=(nsplit, steps),
            in_specs=[pl.BlockSpec((tile_rows, LANES), in_map),
                      pl.BlockSpec((tile_rows, LANES), in_map)],
            out_specs=pl.BlockSpec((1, 4, SUBLANES, LANES),
                                   lambda p, i: (p, 0, 0, 0)),
        ),
        compiler_params=pltpu.CompilerParams(
            dimension_semantics=("parallel", "arbitrary"),
            vmem_limit_bytes=VMEM_LIMIT_BYTES),
        cost_estimate=pl.CostEstimate(
            flops=14 * n, transcendentals=2 * n,
            bytes_accessed=8 * n + 4 * 4 * SUBLANES * LANES * nsplit),
    )(x2d, t2d)
    return jnp.sum(acc, axis=(0, 2, 3))   # (4,) partial sums


def _combo_loss_ref(inputs, targets, smooth=1.0, eps=1e-9):
    x = jnp.asarray(inputs, jnp.float32).reshape(-1)
    t = jnp.asarray(targets, jnp.float32).reshape(-1)
    intersection = jnp.sum(x * t)
    dice = (2.0 * intersection + smooth) / (jnp.sum(x) + jnp.sum(t) + smooth)
    xc = jnp.clip(x, eps, 1.0 - eps)
    out = -(ALPHA * (t * jnp.log(xc)
                     + (1.0 - ALPHA) * (1.0 - t) * jnp.log(1.0 - xc)))
    weighted_ce = jnp.mean(out)
    return CE_RATIO * weighted_ce - (1.0 - CE_RATIO) * dice


def combo_loss(inputs, targets, smooth=1.0, eps=1e-9, use_pallas=None,
               binary_targets=False):
    # NOTE: eps=1e-9 mirrors the PyTorch module exactly; in f32 the upper clip
    # bound (1 - 1e-9) rounds to 1.0, so inputs exactly equal to 1.0 still hit
    # log(0), just like the float32 reference does.
    x = jnp.asarray(inputs, jnp.float32).reshape(-1)
    t = jnp.asarray(targets, jnp.float32).reshape(-1)
    n = x.shape[0]

    if use_pallas is None:
        # Tiny inputs: fixed pallas_call + per-step overhead dominates.
        use_pallas = n >= AUTO_PALLAS_MIN_ELEMS
    if not (use_pallas and n >= FORCE_PALLAS_MIN_ELEMS):
        return _combo_loss_ref(inputs, targets, smooth=smooth, eps=eps)

    # Pad only to the next multiple of 128 lanes (copy is 8x rarer than the
    # old 1024-element alignment); the in-kernel row-space mask absorbs both
    # the pad and the partial last row-block.
    pad = (-n) % LANES
    if pad:
        x = jnp.pad(x, (0, pad))
        t = jnp.pad(t, (0, pad))
    rows = (n + pad) // LANES
    x = x.reshape(rows, LANES)
    t = t.reshape(rows, LANES)

    partials = _combo_partials_pallas(x, t, n, _nsplit_for_device(),
                                      binary_targets, eps)
    intersection, sum_x, sum_t, ce_comb = (partials[0], partials[1],
                                           partials[2], partials[3])
    dice = (2.0 * intersection + smooth) / (sum_x + sum_t + smooth)
    weighted_ce = (-ALPHA * ce_comb) / n
    return CE_RATIO * weighted_ce - (1.0 - CE_RATIO) * dice


# TODO(synk): ComboLoss.HausdorffLoss (dead code, never called by forward) is
# not implemented here.

if __name__ == "__main__":
    key = jax.random.PRNGKey(0)
    k1, k2, k3, k4 = jax.random.split(key, 4)

    # Small shape consistent with the module (B=2, C=4, 16x16 masks); forced
    # through the Pallas kernel (auto-dispatch would pick the jnp path here).
    inputs = jax.random.uniform(k1, (2, 4, 16, 16), dtype=jnp.float32,
                                minval=0.0, maxval=1.0)
    targets = (jax.random.uniform(k2, (2, 4, 16, 16)) > 0.5).astype(jnp.float32)

    loss_fn = jax.jit(functools.partial(combo_loss, use_pallas=True))
    loss = jax.block_until_ready(loss_fn(inputs, targets))
    ref = _combo_loss_ref(inputs, targets)
    assert jnp.allclose(loss, ref, rtol=2e-5, atol=1e-5), (loss, ref)

    # Larger ragged shape: exercises multi-tile accumulation, the 128-element
    # pad + masked boundary block, and the MXU column fold (auto-dispatch).
    big_in = jax.random.uniform(k3, (3, 7, 401, 131), dtype=jnp.float32,
                                minval=0.0, maxval=1.0)
    big_tg = (jax.random.uniform(k4, (3, 7, 401, 131)) > 0.5).astype(jnp.float32)
    big_loss = jax.block_until_ready(jax.jit(combo_loss)(big_in, big_tg))
    big_ref = _combo_loss_ref(big_in, big_tg)
    assert jnp.allclose(big_loss, big_ref, rtol=1e-4, atol=1e-4), (big_loss, big_ref)

    print("KERNEL_OK")
</pallas_src>

<mosaic_0001>
module attributes {stable_mosaic.version = 11 : i64} {
  func.func @_combo_kernel(%arg0: i32, %arg1: i32, %arg2: memref<16x128xf32, #tpu.memory_space<vmem>>, %arg3: memref<16x128xf32, #tpu.memory_space<vmem>>, %arg4: memref<1x4x8x128xf32, #tpu.memory_space<vmem>>) attributes {dimension_semantics = [#tpu.dimension_semantics<parallel>, #tpu.dimension_semantics<arbitrary>], iteration_bounds = array<i64: 1, 1>, scalar_prefetch = 0 : i64, scratch_operands = 0 : i64, tpu.core_type = #tpu.core_type<tc>, window_params = [{transform_indices = @transform_0, window_bounds = array<i64: 16, 128>}, {transform_indices = @transform_1, window_bounds = array<i64: 16, 128>}, {transform_indices = @transform_2, window_bounds = array<i64: 1, 4, 8, 128>}]} {
    %c1_i32 = arith.constant 1 : i32
    %0 = arith.muli %arg0, %c1_i32 : i32
    %1 = arith.addi %0, %arg1 : i32
    %c0_i32 = arith.constant 0 : i32
    %2 = arith.cmpi eq, %arg1, %c0_i32 : i32
    %3 = arith.extui %2 : i1 to i32
    %c0_i32_0 = arith.constant 0 : i32
    %4 = arith.cmpi ne, %3, %c0_i32_0 : i32
    scf.if %4 {
      %cst_11 = arith.constant 0.000000e+00 : f32
      %21 = vector.broadcast %cst_11 : f32 to vector<1x4x8x128xf32>
      %c0_12 = arith.constant 0 : index
      %c0_13 = arith.constant 0 : index
      %c0_14 = arith.constant 0 : index
      %c0_15 = arith.constant 0 : index
      %22 = vector.load %arg4[%c0_12, %c0_13, %c0_14, %c0_15] : memref<1x4x8x128xf32, #tpu.memory_space<vmem>>, vector<1x4x8x128xf32>
      tpu.vector_store %arg4[%c0_12, %c0_13, %c0_14, %c0_15], %21 {strides = array<i32>} : memref<1x4x8x128xf32, #tpu.memory_space<vmem>>, vector<1x4x8x128xf32>,
    } else {
    }
    %cst = arith.constant 0.000000e+00 : f32
    %5 = vector.broadcast %cst : f32 to vector<8x128xf32>
    %c1_i32_1 = arith.constant 1 : i32
    %6 = arith.addi %1, %c1_i32_1 : i32
    %c16_i32 = arith.constant 16 : i32
    %7 = arith.muli %6, %c16_i32 : i32
    %c16_i32_2 = arith.constant 16 : i32
    %8 = arith.cmpi sgt, %7, %c16_i32_2 : i32
    %9 = arith.extui %8 : i1 to i32
    %c0_i32_3 = arith.constant 0 : i32
    %10 = arith.cmpi ne, %9, %c0_i32_3 : i32
    %11:4 = scf.if %10 -> (vector<8x128xf32>, vector<8x128xf32>, vector<8x128xf32>, vector<8x128xf32>) {
      %c0_i32_11 = arith.constant 0 : i32
      %c8_i32 = arith.constant 8 : i32
      %21 = arith.muli %c0_i32_11, %c8_i32 : i32
      %22 = tpu.assume_multiple %21, 8 : i32
      %23 = arith.index_cast %22 : i32 to index
      %c0_12 = arith.constant 0 : index
      %24 = vector.load %arg2[%23, %c0_12] : memref<16x128xf32, #tpu.memory_space<vmem>>, vector<8x128xf32>
      %25 = arith.index_cast %22 : i32 to index
      %c0_13 = arith.constant 0 : index
      %26 = vector.load %arg3[%25, %c0_13] : memref<16x128xf32, #tpu.memory_space<vmem>>, vector<8x128xf32>
      %cst_14 = arith.constant 9.99999971E-10 : f32
      %cst_15 = arith.constant 1.000000e+00 : f32
      %27 = vector.broadcast %cst_14 : f32 to vector<8x128xf32>
      %28 = arith.maximumf %27, %24 : vector<8x128xf32>
      %29 = vector.broadcast %cst_15 : f32 to vector<8x128xf32>
      %30 = arith.minimumf %29, %28 : vector<8x128xf32>
      %31 = math.log %30 : vector<8x128xf32>
      %32 = arith.mulf %26, %31 : vector<8x128xf32>
      %cst_16 = arith.constant 1.000000e+00 : f32
      %33 = vector.broadcast %cst_16 : f32 to vector<8x128xf32>
      %34 = arith.subf %33, %26 : vector<8x128xf32>
      %cst_17 = arith.constant 1.000000e+00 : f32
      %35 = vector.broadcast %cst_17 : f32 to vector<8x128xf32>
      %36 = arith.subf %35, %30 : vector<8x128xf32>
      %37 = math.log %36 : vector<8x128xf32>
      %38 = arith.mulf %34, %37 : vector<8x128xf32>
      %cst_18 = arith.constant 5.000000e-01 : f32
      %39 = vector.broadcast %cst_18 : f32 to vector<8x128xf32>
      %40 = arith.mulf %39, %38 : vector<8x128xf32>
      %41 = arith.addf %32, %40 : vector<8x128xf32>
      %42 = tpu.iota {dimensions = array<i32: 0>} : vector<8x128xi32>
      %43 = tpu.iota {dimensions = array<i32: 1>} : vector<8x128xi32>
      %c16_i32_19 = arith.constant 16 : i32
      %44 = arith.muli %1, %c16_i32_19 : i32
      %45 = arith.addi %44, %22 : i32
      %46 = vector.broadcast %45 : i32 to vector<8x128xi32>
      %47 = arith.addi %46, %42 : vector<8x128xi32>
      %c16_i32_20 = arith.constant 16 : i32
      %48 = vector.broadcast %c16_i32_20 : i32 to vector<8x128xi32>
      %49 = arith.cmpi slt, %47, %48 : vector<8x128xi32>
      %c16_i32_21 = arith.constant 16 : i32
      %50 = vector.broadcast %c16_i32_21 : i32 to vector<8x128xi32>
      %51 = arith.cmpi eq, %47, %50 : vector<8x128xi32>
      %c0_i32_22 = arith.constant 0 : i32
      %52 = vector.broadcast %c0_i32_22 : i32 to vector<8x128xi32>
      %53 = arith.cmpi slt, %43, %52 : vector<8x128xi32>
      %54 = arith.andi %51, %53 : vector<8x128xi1>
      %55 = arith.ori %49, %54 : vector<8x128xi1>
      %cst_23 = arith.constant 0.000000e+00 : f32
      %56 = vector.broadcast %cst_23 : f32 to vector<8x128xf32>
      %57 = arith.select %55, %24, %56 : vector<8x128xi1>, vector<8x128xf32>
      %cst_24 = arith.constant 0.000000e+00 : f32
      %58 = vector.broadcast %cst_24 : f32 to vector<8x128xf32>
      %59 = arith.select %55, %26, %58 : vector<8x128xi1>, vector<8x128xf32>
      %cst_25 = arith.constant 0.000000e+00 : f32
      %60 = vector.broadcast %cst_25 : f32 to vector<8x128xf32>
      %61 = arith.select %55, %41, %60 : vector<8x128xi1>, vector<8x128xf32>
      %62 = arith.mulf %57, %59 : vector<8x128xf32>
      %63 = arith.addf %5, %62 : vector<8x128xf32>
      %64 = arith.addf %5, %57 : vector<8x128xf32>
      %65 = arith.addf %5, %59 : vector<8x128xf32>
      %66 = arith.addf %5, %61 : vector<8x128xf32>
      %c1_i32_26 = arith.constant 1 : i32
      %c8_i32_27 = arith.constant 8 : i32
      %67 = arith.muli %c1_i32_26, %c8_i32_27 : i32
      %68 = tpu.assume_multiple %67, 8 : i32
      %69 = arith.index_cast %68 : i32 to index
      %c0_28 = arith.constant 0 : index
      %70 = vector.load %arg2[%69, %c0_28] : memref<16x128xf32, #tpu.memory_space<vmem>>, vector<8x128xf32>
      %71 = arith.index_cast %68 : i32 to index
      %c0_29 = arith.constant 0 : index
      %72 = vector.load %arg3[%71, %c0_29] : memref<16x128xf32, #tpu.memory_space<vmem>>, vector<8x128xf32>
      %cst_30 = arith.constant 9.99999971E-10 : f32
      %cst_31 = arith.constant 1.000000e+00 : f32
      %73 = vector.broadcast %cst_30 : f32 to vector<8x128xf32>
      %74 = arith.maximumf %73, %70 : vector<8x128xf32>
      %75 = vector.broadcast %cst_31 : f32 to vector<8x128xf32>
      %76 = arith.minimumf %75, %74 : vector<8x128xf32>
      %77 = math.log %76 : vector<8x128xf32>
      %78 = arith.mulf %72, %77 : vector<8x128xf32>
      %cst_32 = arith.constant 1.000000e+00 : f32
      %79 = vector.broadcast %cst_32 : f32 to vector<8x128xf32>
      %80 = arith.subf %79, %72 : vector<8x128xf32>
      %cst_33 = arith.constant 1.000000e+00 : f32
      %81 = vector.broadcast %cst_33 : f32 to vector<8x128xf32>
      %82 = arith.subf %81, %76 : vector<8x128xf32>
      %83 = math.log %82 : vector<8x128xf32>
      %84 = arith.mulf %80, %83 : vector<8x128xf32>
      %cst_34 = arith.constant 5.000000e-01 : f32
      %85 = vector.broadcast %cst_34 : f32 to vector<8x128xf32>
      %86 = arith.mulf %85, %84 : vector<8x128xf32>
      %87 = arith.addf %78, %86 : vector<8x128xf32>
      %88 = tpu.iota {dimensions = array<i32: 0>} : vector<8x128xi32>
      %89 = tpu.iota {dimensions = array<i32: 1>} : vector<8x128xi32>
      %c16_i32_35 = arith.constant 16 : i32
      %90 = arith.muli %1, %c16_i32_35 : i32
      %91 = arith.addi %90, %68 : i32
      %92 = vector.broadcast %91 : i32 to vector<8x128xi32>
      %93 = arith.addi %92, %88 : vector<8x128xi32>
      %c16_i32_36 = arith.constant 16 : i32
      %94 = vector.broadcast %c16_i32_36 : i32 to vector<8x128xi32>
      %95 = arith.cmpi slt, %93, %94 : vector<8x128xi32>
      %c16_i32_37 = arith.constant 16 : i32
      %96 = vector.broadcast %c16_i32_37 : i32 to vector<8x128xi32>
      %97 = arith.cmpi eq, %93, %96 : vector<8x128xi32>
      %c0_i32_38 = arith.constant 0 : i32
      %98 = vector.broadcast %c0_i32_38 : i32 to vector<8x128xi32>
      %99 = arith.cmpi slt, %89, %98 : vector<8x128xi32>
      %100 = arith.andi %97, %99 : vector<8x128xi1>
      %101 = arith.ori %95, %100 : vector<8x128xi1>
      %cst_39 = arith.constant 0.000000e+00 : f32
      %102 = vector.broadcast %cst_39 : f32 to vector<8x128xf32>
      %103 = arith.select %101, %70, %102 : vector<8x128xi1>, vector<8x128xf32>
      %cst_40 = arith.constant 0.000000e+00 : f32
      %104 = vector.broadcast %cst_40 : f32 to vector<8x128xf32>
      %105 = arith.select %101, %72, %104 : vector<8x128xi1>, vector<8x128xf32>
      %cst_41 = arith.constant 0.000000e+00 : f32
      %106 = vector.broadcast %cst_41 : f32 to vector<8x128xf32>
      %107 = arith.select %101, %87, %106 : vector<8x128xi1>, vector<8x128xf32>
      %108 = arith.mulf %103, %105 : vector<8x128xf32>
      %109 = arith.addf %63, %108 : vector<8x128xf32>
      %110 = arith.addf %64, %103 : vector<8x128xf32>
      %111 = arith.addf %65, %105 : vector<8x128xf32>
      %112 = arith.addf %66, %107 : vector<8x128xf32>
      %c2_i32 = arith.constant 2 : i32
      scf.yield %109, %110, %111, %112 : vector<8x128xf32>, vector<8x128xf32>, vector<8x128xf32>, vector<8x128xf32>
    } else {
      %c0_i32_11 = arith.constant 0 : i32
      %c8_i32 = arith.constant 8 : i32
      %21 = arith.muli %c0_i32_11, %c8_i32 : i32
      %22 = tpu.assume_multiple %21, 8 : i32
      %23 = arith.index_cast %22 : i32 to index
      %c0_12 = arith.constant 0 : index
      %24 = vector.load %arg2[%23, %c0_12] : memref<16x128xf32, #tpu.memory_space<vmem>>, vector<8x128xf32>
      %25 = arith.index_cast %22 : i32 to index
      %c0_13 = arith.constant 0 : index
      %26 = vector.load %arg3[%25, %c0_13] : memref<16x128xf32, #tpu.memory_space<vmem>>, vector<8x128xf32>
      %cst_14 = arith.constant 9.99999971E-10 : f32
      %cst_15 = arith.constant 1.000000e+00 : f32
      %27 = vector.broadcast %cst_14 : f32 to vector<8x128xf32>
      %28 = arith.maximumf %27, %24 : vector<8x128xf32>
      %29 = vector.broadcast %cst_15 : f32 to vector<8x128xf32>
      %30 = arith.minimumf %29, %28 : vector<8x128xf32>
      %31 = math.log %30 : vector<8x128xf32>
      %32 = arith.mulf %26, %31 : vector<8x128xf32>
      %cst_16 = arith.constant 1.000000e+00 : f32
      %33 = vector.broadcast %cst_16 : f32 to vector<8x128xf32>
      %34 = arith.subf %33, %26 : vector<8x128xf32>
      %cst_17 = arith.constant 1.000000e+00 : f32
      %35 = vector.broadcast %cst_17 : f32 to vector<8x128xf32>
      %36 = arith.subf %35, %30 : vector<8x128xf32>
      %37 = math.log %36 : vector<8x128xf32>
      %38 = arith.mulf %34, %37 : vector<8x128xf32>
      %cst_18 = arith.constant 5.000000e-01 : f32
      %39 = vector.broadcast %cst_18 : f32 to vector<8x128xf32>
      %40 = arith.mulf %39, %38 : vector<8x128xf32>
      %41 = arith.addf %32, %40 : vector<8x128xf32>
      %42 = arith.mulf %24, %26 : vector<8x128xf32>
      %43 = arith.addf %5, %42 : vector<8x128xf32>
      %44 = arith.addf %5, %24 : vector<8x128xf32>
      %45 = arith.addf %5, %26 : vector<8x128xf32>
      %46 = arith.addf %5, %41 : vector<8x128xf32>
      %c1_i32_19 = arith.constant 1 : i32
      %c8_i32_20 = arith.constant 8 : i32
      %47 = arith.muli %c1_i32_19, %c8_i32_20 : i32
      %48 = tpu.assume_multiple %47, 8 : i32
      %49 = arith.index_cast %48 : i32 to index
      %c0_21 = arith.constant 0 : index
      %50 = vector.load %arg2[%49, %c0_21] : memref<16x128xf32, #tpu.memory_space<vmem>>, vector<8x128xf32>
      %51 = arith.index_cast %48 : i32 to index
      %c0_22 = arith.constant 0 : index
      %52 = vector.load %arg3[%51, %c0_22] : memref<16x128xf32, #tpu.memory_space<vmem>>, vector<8x128xf32>
      %cst_23 = arith.constant 9.99999971E-10 : f32
      %cst_24 = arith.constant 1.000000e+00 : f32
      %53 = vector.broadcast %cst_23 : f32 to vector<8x128xf32>
      %54 = arith.maximumf %53, %50 : vector<8x128xf32>
      %55 = vector.broadcast %cst_24 : f32 to vector<8x128xf32>
      %56 = arith.minimumf %55, %54 : vector<8x128xf32>
      %57 = math.log %56 : vector<8x128xf32>
      %58 = arith.mulf %52, %57 : vector<8x128xf32>
      %cst_25 = arith.constant 1.000000e+00 : f32
      %59 = vector.broadcast %cst_25 : f32 to vector<8x128xf32>
      %60 = arith.subf %59, %52 : vector<8x128xf32>
      %cst_26 = arith.constant 1.000000e+00 : f32
      %61 = vector.broadcast %cst_26 : f32 to vector<8x128xf32>
      %62 = arith.subf %61, %56 : vector<8x128xf32>
      %63 = math.log %62 : vector<8x128xf32>
      %64 = arith.mulf %60, %63 : vector<8x128xf32>
      %cst_27 = arith.constant 5.000000e-01 : f32
      %65 = vector.broadcast %cst_27 : f32 to vector<8x128xf32>
      %66 = arith.mulf %65, %64 : vector<8x128xf32>
      %67 = arith.addf %58, %66 : vector<8x128xf32>
      %68 = arith.mulf %50, %52 : vector<8x128xf32>
      %69 = arith.addf %43, %68 : vector<8x128xf32>
      %70 = arith.addf %44, %50 : vector<8x128xf32>
      %71 = arith.addf %45, %52 : vector<8x128xf32>
      %72 = arith.addf %46, %67 : vector<8x128xf32>
      %c2_i32 = arith.constant 2 : i32
      scf.yield %69, %70, %71, %72 : vector<8x128xf32>, vector<8x128xf32>, vector<8x128xf32>, vector<8x128xf32>
    }
    %c0 = arith.constant 0 : index
    %c0_4 = arith.constant 0 : index
    %c0_5 = arith.constant 0 : index
    %c0_6 = arith.constant 0 : index
    %12 = vector.load %arg4[%c0, %c0_4, %c0_5, %c0_6] : memref<1x4x8x128xf32, #tpu.memory_space<vmem>>, vector<1x4x8x128xf32>
    %13 = vector.shape_cast %11#0 : vector<8x128xf32> to vector<1x8x128xf32>
    %14 = vector.shape_cast %11#1 : vector<8x128xf32> to vector<1x8x128xf32>
    %15 = vector.shape_cast %11#2 : vector<8x128xf32> to vector<1x8x128xf32>
    %16 = vector.shape_cast %11#3 : vector<8x128xf32> to vector<1x8x128xf32>
    %17 = tpu.concatenate %13, %14, %15, %16 in 0 : vector<1x8x128xf32>, vector<1x8x128xf32>, vector<1x8x128xf32>, vector<1x8x128xf32> -> vector<4x8x128xf32>
    %18 = vector.shape_cast %17 : vector<4x8x128xf32> to vector<1x4x8x128xf32>
    %19 = arith.addf %12, %18 : vector<1x4x8x128xf32>
    %c0_7 = arith.constant 0 : index
    %c0_8 = arith.constant 0 : index
    %c0_9 = arith.constant 0 : index
    %c0_10 = arith.constant 0 : index
    %20 = vector.load %arg4[%c0_7, %c0_8, %c0_9, %c0_10] : memref<1x4x8x128xf32, #tpu.memory_space<vmem>>, vector<1x4x8x128xf32>
    tpu.vector_store %arg4[%c0_7, %c0_8, %c0_9, %c0_10], %19 {strides = array<i32>} : memref<1x4x8x128xf32, #tpu.memory_space<vmem>>, vector<1x4x8x128xf32>,
    return
  }
  func.func @transform_0(%arg0: i32, %arg1: i32) -> (i32, i32) {
    %c1_i32 = arith.constant 1 : i32
    %0 = arith.muli %arg0, %c1_i32 : i32
    %1 = arith.addi %0, %arg1 : i32
    %c0_i32 = arith.constant 0 : i32
    %2 = arith.minsi %1, %c0_i32 : i32
    %c0_i32_0 = arith.constant 0 : i32
    %c0_i32_1 = arith.constant 0 : i32
    return %2, %c0_i32_0 : i32, i32
  }
  func.func @transform_1(%arg0: i32, %arg1: i32) -> (i32, i32) {
    %c1_i32 = arith.constant 1 : i32
    %0 = arith.muli %arg0, %c1_i32 : i32
    %1 = arith.addi %0, %arg1 : i32
    %c0_i32 = arith.constant 0 : i32
    %2 = arith.minsi %1, %c0_i32 : i32
    %c0_i32_0 = arith.constant 0 : i32
    %c0_i32_1 = arith.constant 0 : i32
    return %2, %c0_i32_0 : i32, i32
  }
  func.func @transform_2(%arg0: i32, %arg1: i32) -> (i32, i32, i32, i32) {
    %c0_i32 = arith.constant 0 : i32
    %c0_i32_0 = arith.constant 0 : i32
    %c0_i32_1 = arith.constant 0 : i32
    %c0_i32_2 = arith.constant 0 : i32
    return %arg0, %c0_i32, %c0_i32_0, %c0_i32_1 : i32, i32, i32, i32
  }
}

</mosaic_0001>

<bundles_post_ra>
// kernel: combo_loss.1
= control target key start
LH: loop header
LB: loop body
LE: loop exit
PB: predicated region body
PF: predicated region fallthrough
CT: control target
= control target key end

     0   :  { %s287_s0 = inlined_call_operand.vmem [shape: f32[16,128], index: 0, kind: input, shape index: {}]   ;;  %s288_s1 = inlined_call_operand.vmem [shape: f32[16,128], index: 1, kind: input, shape index: {}]   ;;  %s289_s2 = inlined_call_operand.vmem [shape: f32[1,4,8,128], index: 2, kind: output, shape index: {}]  }
   0x1   :  { %v163_v0 = vld [vmem:[%s287_s0] sm:$0xff]  ;;  %v237_v2 = vld [vmem:[%s287_s0 + $0x8] sm:$0xff] }
   0x2   :  { %v164_v1 = vld [vmem:[%s288_s1] sm:$0xff]  ;;  %v165_v3 = vmax.f32 %v163_v0, 1e-09  ;;  %v238_v5 = vld [vmem:[%s288_s1 + $0x8] sm:$0xff]  ;;  %v186_v6 = vmax.f32 %v237_v2, 1e-09  ;;  %v200_v7 = vadd.f32 %v237_v2, %v163_v0 }
   0x3   :  { %v177_v4 = vmul.f32 %v164_v1, %v163_v0  ;;  %v198_v8 = vmul.f32 %v238_v5, %v237_v2  ;;  %v201_v9 = vadd.f32 %v238_v5, %v164_v1  ;;  %v170_v18 = vsub.f32 1.0, %v164_v1 }
   0x4   :  { %v166_v10 = vmin.f32 %v165_v3, 1.0  ;;  %v187_v11 = vmin.f32 %v186_v6, 1.0  ;;  %216 = vst [vmem:[%s289_s2 + $0x8] sm:$0xff] %v200_v7  ;;  %v191_v21 = vsub.f32 1.0, %v238_v5 }
   0x5   :  { %v199_v12 = vadd.f32 %v198_v8, %v177_v4  ;;  %217 = vst [vmem:[%s289_s2 + $0x10] sm:$0xff] %v201_v9 }
   0x6   :  { %v171_v13 = vsub.f32 1.0, %v166_v10  ;;  %v192_v14 = vsub.f32 1.0, %v187_v11  ;;  %240 = vlog2.f32 %v166_v10 }
   0x7   :  { %242 = vlog2.f32 %v187_v11  ;;  %215 = vst [vmem:[%s289_s2] sm:$0xff] %v199_v12 }
   0x8   :  { %244 = vlog2.f32 %v171_v13 }
   0x9   :  { %246 = vlog2.f32 %v192_v14 }
  0x10   :  { %v241_v15 = vpop.eup %240 }
  0x11   :  { %v243_v16 = vpop.eup %242  ;;  %v168_v17 = vmul.f32 0.6931472, %v241_v15 }
  0x12   :  { %v245_v19 = vpop.eup %244  ;;  %v189_v20 = vmul.f32 0.6931472, %v243_v16 }
  0x13   :  { %v247_v22 = vpop.eup %246  ;;  %v173_v23 = vmul.f32 0.6931472, %v245_v19  ;;  %v169_v25 = vmul.f32 %v168_v17, %v164_v1 }
  0x14   :  { %v194_v24 = vmul.f32 0.6931472, %v247_v22  ;;  %v190_v27 = vmul.f32 %v238_v5, %v189_v20 }
  0x15   :  { %v174_v26 = vmul.f32 %v173_v23, %v170_v18 }
  0x16   :  { %v195_v28 = vmul.f32 %v194_v24, %v191_v21 }
  0x17   :  { %v175_v29 = vmul.f32 0.5, %v174_v26 }
  0x18   :  { %v196_v30 = vmul.f32 0.5, %v195_v28 }
  0x19   :  { %v176_v31 = vadd.f32 %v175_v29, %v169_v25 }
  0x1a   :  { %v197_v32 = vadd.f32 %v196_v30, %v190_v27 }
  0x1c   :  { %v202_v33 = vadd.f32 %v197_v32, %v176_v31 }
  0x1e   :  { %218 = vst [vmem:[%s289_s2 + $0x18] sm:$0xff] %v202_v33 }

</bundles_post_ra>
